<compile_context>
chip_gen: v7x
topology: tpu7x:2x2x1
jax: 0.10.0
libtpu: 0.0.40
codegen_flags: <defaults>
</compile_context>

<pallas_src>
import functools

import jax
import jax.numpy as jnp
from jax.experimental import pallas as pl
from jax.experimental.pallas import tpu as pltpu


# ---------------------------------------------------------------------------
# tiling helper
# ---------------------------------------------------------------------------
def _choose_tiles(T, c_block, HW, itemsize, x_block_budget=4 * 1024 * 1024):
    """Pick (t_blk, hw_tile): timesteps folded per grid step and the
    lane-dense HW tile (multiple of 128 that divides HW, or full HW)."""
    t_blk = min(T, 8)
    max_hw = max(128, x_block_budget // max(1, t_blk * c_block * itemsize))
    if HW <= max_hw or HW % 128 != 0:
        return t_blk, HW                      # full spatial extent per block
    hw_tile = (min(max_hw, HW) // 128) * 128
    while hw_tile > 128 and HW % hw_tile != 0:
        hw_tile -= 128
    if HW % hw_tile != 0:
        hw_tile = HW
    return t_blk, hw_tile


# ---------------------------------------------------------------------------
# kernels
# ---------------------------------------------------------------------------
def _dense_weight_sum_kernel(x_ref, w_ref, o_ref, acc_ref, *, t_blk, T):
    """x_ref (t_blk, Cg, hw), w_ref (t_blk, 1, hw) f32, o_ref (Cg, hw),
    acc_ref f32 scratch. Grid = (B, G, HW_tiles, T_blocks)."""
    tb = pl.program_id(3)

    @pl.when(tb == 0)
    def _():
        acc_ref[...] = jnp.zeros_like(acc_ref)

    part = jnp.zeros(acc_ref.shape, jnp.float32)
    for tt in range(t_blk):                       # static unroll over T-block
        contrib = x_ref[tt].astype(jnp.float32) * w_ref[tt].astype(jnp.float32)
        if T % t_blk != 0:                        # mask tail T-block (static)
            t_idx = tb * t_blk + tt
            contrib = jnp.where(t_idx < T, contrib, 0.0)
        part = part + contrib
    acc_ref[...] += part                          # one RMW per T-block

    @pl.when(tb == pl.num_programs(3) - 1)
    def _():
        o_ref[...] = acc_ref[...].astype(o_ref.dtype)


def _scalar_weight_sum_kernel(keep_ref, cnt_ref, x_ref, o_ref, acc_ref, *,
                              t_blk, T):
    """'mean' mode: keep_ref (B,T) int32 and cnt_ref (B,) int32 live in SMEM
    (scalar prefetch); x_ref (t_blk, C, hw); o = sum_t keep*x / cnt.
    Grid = (B, HW_tiles, T_blocks)."""
    b = pl.program_id(0)
    tb = pl.program_id(2)

    @pl.when(tb == 0)
    def _():
        acc_ref[...] = jnp.zeros_like(acc_ref)

    part = jnp.zeros(acc_ref.shape, jnp.float32)
    for tt in range(t_blk):
        t_idx = tb * t_blk + tt
        t_clamped = jnp.minimum(t_idx, T - 1)     # avoid OOB SMEM read at tail
        w = keep_ref[b, t_clamped].astype(jnp.float32)
        contrib = x_ref[tt].astype(jnp.float32) * w
        if T % t_blk != 0:
            contrib = jnp.where(t_idx < T, contrib, 0.0)
        part = part + contrib
    acc_ref[...] += part

    @pl.when(tb == pl.num_programs(2) - 1)
    def _():
        inv = 1.0 / cnt_ref[b].astype(jnp.float32)
        o_ref[...] = (acc_ref[...] * inv).astype(o_ref.dtype)


# ---------------------------------------------------------------------------
# wrappers
# ---------------------------------------------------------------------------
def weighted_temporal_sum_grouped(x, w, n_groups):
    """out[b, g*Cg + c, h, w] = sum_t w[g, b, t, h, w] * x[b, t, g*Cg + c, h, w]

    x: (B, T, C, H, W) any float dtype;  w: (G, B, T, H, W)  ->  (B, C, H, W).
    G = 1 reproduces the plain attention-weighted sum ('att_mean')."""
    B, T, C, H, W = x.shape
    G = n_groups
    assert C % G == 0, "channels must divide evenly into groups"
    Cg = C // G
    HW = H * W

    x5 = x.reshape(B, T, G, Cg, HW)                       # free reshape
    w5 = w.reshape(G, B, T, 1, HW).astype(jnp.float32)    # small vs. x

    t_blk, hw_tile = _choose_tiles(T, Cg, HW, jnp.dtype(x.dtype).itemsize)
    grid = (B, G, HW // hw_tile, pl.cdiv(T, t_blk))
    kernel = functools.partial(_dense_weight_sum_kernel, t_blk=t_blk, T=T)

    out = pl.pallas_call(
        kernel,
        out_shape=jax.ShapeDtypeStruct((B, G, Cg, HW), x.dtype),
        grid=grid,
        in_specs=[
            pl.BlockSpec((None, t_blk, None, Cg, hw_tile),
                         lambda b, g, s, tb: (b, tb, g, 0, s)),
            pl.BlockSpec((None, None, t_blk, 1, hw_tile),
                         lambda b, g, s, tb: (g, b, tb, 0, s)),
        ],
        out_specs=pl.BlockSpec((None, None, Cg, hw_tile),
                               lambda b, g, s, tb: (b, g, 0, s)),
        scratch_shapes=[pltpu.VMEM((Cg, hw_tile), jnp.float32)],
        compiler_params=pltpu.CompilerParams(
            dimension_semantics=("parallel", "parallel", "parallel", "arbitrary"),
            vmem_limit_bytes=32 * 1024 * 1024),
    )(x5, w5)
    return out.reshape(B, C, H, W)


def masked_temporal_mean(x, keep, cnt):
    """out[b] = sum_t keep[b,t] * x[b,t] / cnt[b], keep/cnt passed via SMEM.

    x: (B, T, C, H, W); keep: (B, T) int 0/1; cnt: (B,) int -> (B, C, H, W)."""
    B, T, C, H, W = x.shape
    HW = H * W
    x4 = x.reshape(B, T, C, HW)

    t_blk, hw_tile = _choose_tiles(T, C, HW, jnp.dtype(x.dtype).itemsize)
    grid = (B, HW // hw_tile, pl.cdiv(T, t_blk))
    kernel = functools.partial(_scalar_weight_sum_kernel, t_blk=t_blk, T=T)

    out = pl.pallas_call(
        kernel,
        out_shape=jax.ShapeDtypeStruct((B, C, HW), x.dtype),
        grid_spec=pltpu.PrefetchScalarGridSpec(
            num_scalar_prefetch=2,
            grid=grid,
            in_specs=[pl.BlockSpec((None, t_blk, C, hw_tile),
                                   lambda b, s, tb, keep_r, cnt_r: (b, tb, 0, s))],
            out_specs=pl.BlockSpec((None, C, hw_tile),
                                   lambda b, s, tb, keep_r, cnt_r: (b, 0, s)),
            scratch_shapes=[pltpu.VMEM((C, hw_tile), jnp.float32)]),
        compiler_params=pltpu.CompilerParams(
            dimension_semantics=("parallel", "parallel", "arbitrary"),
            vmem_limit_bytes=32 * 1024 * 1024),
    )(keep.astype(jnp.int32), cnt.astype(jnp.int32), x4)
    return out.reshape(B, C, H, W)


# ---------------------------------------------------------------------------
# attention-map resizing glue (plain JAX; matches the torch branches)
# ---------------------------------------------------------------------------
def _resize_attn(attn, out_hw):
    """torch: Upsample(bilinear, align_corners=False) if H > attn_width,
    else AvgPool2d(kernel_size = attn_width // H)."""
    N, T, h, w = attn.shape
    H, W = out_hw
    if H > w:
        return jax.image.resize(attn, (N, T, H, W), method="bilinear",
                                antialias=False)
    k = w // H                                   # same kernel as torch
    hh, ww = (h // k) * k, (w // k) * k          # AvgPool2d floors
    a = attn[:, :, :hh, :ww]
    return a.reshape(N, T, h // k, k, w // k, k).mean(axis=(3, 5))


# ---------------------------------------------------------------------------
# module
# ---------------------------------------------------------------------------
class TemporalAggregator:
    """JAX/Pallas port of Temporal_Aggregator (mode in {'mean','att_mean','att_group'}).

    The 'has padding' decision is static (pad_mask is None or not); applying a
    keep-mask of all-ones is mathematically identical to the torch no-pad
    branch, so no data-dependent host sync is needed and the call is jittable."""

    def __init__(self, mode="mean"):
        self.mode = mode

    def __call__(self, x, pad_mask=None, attn_mask=None):
        B, T, C, H, W = x.shape

        if self.mode == "mean":
            if pad_mask is not None:
                keep = (~pad_mask).astype(jnp.int32)              # (B, T)
                cnt = keep.sum(axis=1)                            # (B,)
            else:
                keep = jnp.ones((B, T), jnp.int32)
                cnt = jnp.full((B,), T, jnp.int32)
            return masked_temporal_mean(x, keep, cnt)

        if self.mode == "att_group":
            n_heads, b, t, h, w = attn_mask.shape
            attn = attn_mask.reshape(n_heads * b, t, h, w)
            attn = _resize_attn(attn, (H, W))
            attn = attn.reshape(n_heads, b, t, H, W)
            if pad_mask is not None:
                attn = attn * (~pad_mask).astype(attn.dtype)[None, :, :, None, None]
            return weighted_temporal_sum_grouped(x, attn, n_heads)

        if self.mode == "att_mean":
            attn = attn_mask.mean(axis=0)                         # (B, T, h, w)
            attn = jax.image.resize(attn, (B, T, H, W), method="bilinear",
                                    antialias=False)
            if pad_mask is not None:
                attn = attn * (~pad_mask).astype(attn.dtype)[:, :, None, None]
            return weighted_temporal_sum_grouped(x, attn[None], 1)

        raise ValueError(f"unknown mode {self.mode}")


# ---------------------------------------------------------------------------
# demo / self-check
# ---------------------------------------------------------------------------
if __name__ == "__main__":
    key = jax.random.PRNGKey(0)
    B, T, C, H, W = 2, 8, 4, 16, 16
    n_heads, h_att = 2, 8
    k1, k2 = jax.random.split(key, 2)

    x = jax.random.normal(k1, (B, T, C, H, W), jnp.float32)
    attn_mask = jax.nn.softmax(
        jax.random.normal(k2, (n_heads, B, T, h_att, h_att), jnp.float32), axis=2)
    lengths = jnp.array([T, T - 2])
    pad_mask = jnp.arange(T)[None, :] >= lengths[:, None]         # (B, T) bool
    keepf = (~pad_mask).astype(jnp.float32)

    outs = {}
    for mode in ("mean", "att_mean", "att_group"):
        agg = TemporalAggregator(mode)
        out_pad = jax.block_until_ready(agg(x, pad_mask=pad_mask, attn_mask=attn_mask))
        out_nopad = jax.block_until_ready(agg(x, pad_mask=None, attn_mask=attn_mask))
        assert out_pad.shape == (B, C, H, W)
        assert out_nopad.shape == (B, C, H, W)
        outs[mode] = (out_pad, out_nopad)

    # ---- pure-JAX references (same resize glue, jnp reductions) ----
    ref_mean_pad = (x * keepf[:, :, None, None, None]).sum(1) / \
        keepf.sum(1)[:, None, None, None]
    ref_mean_nopad = x.mean(axis=1)

    am = attn_mask.mean(axis=0)
    am = jax.image.resize(am, (B, T, H, W), method="bilinear", antialias=False)
    ref_attmean_pad = (x * (am * keepf[:, :, None, None])[:, :, None, :, :]).sum(1)
    ref_attmean_nopad = (x * am[:, :, None, :, :]).sum(1)

    Cg = C // n_heads
    ag = _resize_attn(attn_mask.reshape(n_heads * B, T, h_att, h_att), (H, W))
    ag = ag.reshape(n_heads, B, T, H, W)
    xg = x.reshape(B, T, n_heads, Cg, H, W)
    ref_attgrp_nopad = jnp.einsum("gbthw,btgchw->bgchw", ag, xg).reshape(B, C, H, W)
    ref_attgrp_pad = jnp.einsum(
        "gbthw,btgchw->bgchw", ag * keepf[None, :, :, None, None], xg
    ).reshape(B, C, H, W)

    def _ok(a, b):
        return bool(jnp.allclose(a, b, atol=1e-4, rtol=1e-4))

    assert _ok(outs["mean"][0], ref_mean_pad), "mean (pad) mismatch"
    assert _ok(outs["mean"][1], ref_mean_nopad), "mean (no pad) mismatch"
    assert _ok(outs["att_mean"][0], ref_attmean_pad), "att_mean (pad) mismatch"
    assert _ok(outs["att_mean"][1], ref_attmean_nopad), "att_mean (no pad) mismatch"
    assert _ok(outs["att_group"][0], ref_attgrp_pad), "att_group (pad) mismatch"
    assert _ok(outs["att_group"][1], ref_attgrp_nopad), "att_group (no pad) mismatch"

    print("KERNEL_OK")
</pallas_src>

<mosaic_0001>
module attributes {stable_mosaic.version = 11 : i64} {
  func.func @_scalar_weight_sum_kernel(%arg0: i32, %arg1: i32, %arg2: i32, %arg3: memref<2x8xi32, #tpu.memory_space<smem>>, %arg4: memref<2xi32, #tpu.memory_space<smem>>, %arg5: memref<1x8x4x256xf32, #tpu.memory_space<vmem>>, %arg6: memref<1x4x256xf32, #tpu.memory_space<vmem>>, %arg7: memref<4x256xf32, #tpu.memory_space<vmem>>) attributes {dimension_semantics = [#tpu.dimension_semantics<parallel>, #tpu.dimension_semantics<parallel>, #tpu.dimension_semantics<arbitrary>], iteration_bounds = array<i64: 2, 1, 1>, scalar_prefetch = 2 : i64, scratch_operands = 1 : i64, tpu.core_type = #tpu.core_type<tc>, window_params = [{transform_indices = @transform_0, window_bounds = array<i64: 1, 8, 4, 256>}, {transform_indices = @transform_1, window_bounds = array<i64: 1, 4, 256>}]} {
    %c0_i32 = arith.constant 0 : i32
    %0 = arith.cmpi eq, %arg2, %c0_i32 : i32
    %1 = arith.extui %0 : i1 to i32
    %c0_i32_0 = arith.constant 0 : i32
    %2 = arith.cmpi ne, %1, %c0_i32_0 : i32
    scf.if %2 {
      %cst_47 = arith.constant 0.000000e+00 : f32
      %106 = vector.broadcast %cst_47 : f32 to vector<4x256xf32>
      %c0_48 = arith.constant 0 : index
      %c0_49 = arith.constant 0 : index
      %107 = vector.load %arg7[%c0_48, %c0_49] : memref<4x256xf32, #tpu.memory_space<vmem>>, vector<4x256xf32>
      tpu.vector_store %arg7[%c0_48, %c0_49], %106 {strides = array<i32>} : memref<4x256xf32, #tpu.memory_space<vmem>>, vector<4x256xf32>,
    } else {
    }
    %cst = arith.constant 0.000000e+00 : f32
    %3 = vector.broadcast %cst : f32 to vector<4x256xf32>
    %c8_i32 = arith.constant 8 : i32
    %4 = arith.muli %arg2, %c8_i32 : i32
    %c0_i32_1 = arith.constant 0 : i32
    %5 = arith.addi %4, %c0_i32_1 : i32
    %c7_i32 = arith.constant 7 : i32
    %6 = arith.minsi %5, %c7_i32 : i32
    %7 = arith.index_cast %arg0 : i32 to index
    %8 = arith.index_cast %6 : i32 to index
    %9 = memref.load %arg3[%7, %8] : memref<2x8xi32, #tpu.memory_space<smem>>
    %10 = arith.sitofp %9 : i32 to f32
    %c0 = arith.constant 0 : index
    %c0_2 = arith.constant 0 : index
    %c0_3 = arith.constant 0 : index
    %c0_4 = arith.constant 0 : index
    %11 = vector.load %arg5[%c0, %c0_2, %c0_3, %c0_4] : memref<1x8x4x256xf32, #tpu.memory_space<vmem>>, vector<1x1x4x256xf32>
    %12 = vector.shape_cast %11 : vector<1x1x4x256xf32> to vector<4x256xf32>
    %13 = vector.broadcast %10 : f32 to vector<4x256xf32>
    %14 = arith.mulf %12, %13 : vector<4x256xf32>
    %15 = arith.addf %3, %14 : vector<4x256xf32>
    %c8_i32_5 = arith.constant 8 : i32
    %16 = arith.muli %arg2, %c8_i32_5 : i32
    %c1_i32 = arith.constant 1 : i32
    %17 = arith.addi %16, %c1_i32 : i32
    %c7_i32_6 = arith.constant 7 : i32
    %18 = arith.minsi %17, %c7_i32_6 : i32
    %19 = arith.index_cast %arg0 : i32 to index
    %20 = arith.index_cast %18 : i32 to index
    %21 = memref.load %arg3[%19, %20] : memref<2x8xi32, #tpu.memory_space<smem>>
    %22 = arith.sitofp %21 : i32 to f32
    %c0_7 = arith.constant 0 : index
    %c1 = arith.constant 1 : index
    %c0_8 = arith.constant 0 : index
    %c0_9 = arith.constant 0 : index
    %23 = vector.load %arg5[%c0_7, %c1, %c0_8, %c0_9] : memref<1x8x4x256xf32, #tpu.memory_space<vmem>>, vector<1x1x4x256xf32>
    %24 = vector.shape_cast %23 : vector<1x1x4x256xf32> to vector<4x256xf32>
    %25 = vector.broadcast %22 : f32 to vector<4x256xf32>
    %26 = arith.mulf %24, %25 : vector<4x256xf32>
    %27 = arith.addf %15, %26 : vector<4x256xf32>
    %c8_i32_10 = arith.constant 8 : i32
    %28 = arith.muli %arg2, %c8_i32_10 : i32
    %c2_i32 = arith.constant 2 : i32
    %29 = arith.addi %28, %c2_i32 : i32
    %c7_i32_11 = arith.constant 7 : i32
    %30 = arith.minsi %29, %c7_i32_11 : i32
    %31 = arith.index_cast %arg0 : i32 to index
    %32 = arith.index_cast %30 : i32 to index
    %33 = memref.load %arg3[%31, %32] : memref<2x8xi32, #tpu.memory_space<smem>>
    %34 = arith.sitofp %33 : i32 to f32
    %c0_12 = arith.constant 0 : index
    %c2 = arith.constant 2 : index
    %c0_13 = arith.constant 0 : index
    %c0_14 = arith.constant 0 : index
    %35 = vector.load %arg5[%c0_12, %c2, %c0_13, %c0_14] : memref<1x8x4x256xf32, #tpu.memory_space<vmem>>, vector<1x1x4x256xf32>
    %36 = vector.shape_cast %35 : vector<1x1x4x256xf32> to vector<4x256xf32>
    %37 = vector.broadcast %34 : f32 to vector<4x256xf32>
    %38 = arith.mulf %36, %37 : vector<4x256xf32>
    %39 = arith.addf %27, %38 : vector<4x256xf32>
    %c8_i32_15 = arith.constant 8 : i32
    %40 = arith.muli %arg2, %c8_i32_15 : i32
    %c3_i32 = arith.constant 3 : i32
    %41 = arith.addi %40, %c3_i32 : i32
    %c7_i32_16 = arith.constant 7 : i32
    %42 = arith.minsi %41, %c7_i32_16 : i32
    %43 = arith.index_cast %arg0 : i32 to index
    %44 = arith.index_cast %42 : i32 to index
    %45 = memref.load %arg3[%43, %44] : memref<2x8xi32, #tpu.memory_space<smem>>
    %46 = arith.sitofp %45 : i32 to f32
    %c0_17 = arith.constant 0 : index
    %c3 = arith.constant 3 : index
    %c0_18 = arith.constant 0 : index
    %c0_19 = arith.constant 0 : index
    %47 = vector.load %arg5[%c0_17, %c3, %c0_18, %c0_19] : memref<1x8x4x256xf32, #tpu.memory_space<vmem>>, vector<1x1x4x256xf32>
    %48 = vector.shape_cast %47 : vector<1x1x4x256xf32> to vector<4x256xf32>
    %49 = vector.broadcast %46 : f32 to vector<4x256xf32>
    %50 = arith.mulf %48, %49 : vector<4x256xf32>
    %51 = arith.addf %39, %50 : vector<4x256xf32>
    %c8_i32_20 = arith.constant 8 : i32
    %52 = arith.muli %arg2, %c8_i32_20 : i32
    %c4_i32 = arith.constant 4 : i32
    %53 = arith.addi %52, %c4_i32 : i32
    %c7_i32_21 = arith.constant 7 : i32
    %54 = arith.minsi %53, %c7_i32_21 : i32
    %55 = arith.index_cast %arg0 : i32 to index
    %56 = arith.index_cast %54 : i32 to index
    %57 = memref.load %arg3[%55, %56] : memref<2x8xi32, #tpu.memory_space<smem>>
    %58 = arith.sitofp %57 : i32 to f32
    %c0_22 = arith.constant 0 : index
    %c4 = arith.constant 4 : index
    %c0_23 = arith.constant 0 : index
    %c0_24 = arith.constant 0 : index
    %59 = vector.load %arg5[%c0_22, %c4, %c0_23, %c0_24] : memref<1x8x4x256xf32, #tpu.memory_space<vmem>>, vector<1x1x4x256xf32>
    %60 = vector.shape_cast %59 : vector<1x1x4x256xf32> to vector<4x256xf32>
    %61 = vector.broadcast %58 : f32 to vector<4x256xf32>
    %62 = arith.mulf %60, %61 : vector<4x256xf32>
    %63 = arith.addf %51, %62 : vector<4x256xf32>
    %c8_i32_25 = arith.constant 8 : i32
    %64 = arith.muli %arg2, %c8_i32_25 : i32
    %c5_i32 = arith.constant 5 : i32
    %65 = arith.addi %64, %c5_i32 : i32
    %c7_i32_26 = arith.constant 7 : i32
    %66 = arith.minsi %65, %c7_i32_26 : i32
    %67 = arith.index_cast %arg0 : i32 to index
    %68 = arith.index_cast %66 : i32 to index
    %69 = memref.load %arg3[%67, %68] : memref<2x8xi32, #tpu.memory_space<smem>>
    %70 = arith.sitofp %69 : i32 to f32
    %c0_27 = arith.constant 0 : index
    %c5 = arith.constant 5 : index
    %c0_28 = arith.constant 0 : index
    %c0_29 = arith.constant 0 : index
    %71 = vector.load %arg5[%c0_27, %c5, %c0_28, %c0_29] : memref<1x8x4x256xf32, #tpu.memory_space<vmem>>, vector<1x1x4x256xf32>
    %72 = vector.shape_cast %71 : vector<1x1x4x256xf32> to vector<4x256xf32>
    %73 = vector.broadcast %70 : f32 to vector<4x256xf32>
    %74 = arith.mulf %72, %73 : vector<4x256xf32>
    %75 = arith.addf %63, %74 : vector<4x256xf32>
    %c8_i32_30 = arith.constant 8 : i32
    %76 = arith.muli %arg2, %c8_i32_30 : i32
    %c6_i32 = arith.constant 6 : i32
    %77 = arith.addi %76, %c6_i32 : i32
    %c7_i32_31 = arith.constant 7 : i32
    %78 = arith.minsi %77, %c7_i32_31 : i32
    %79 = arith.index_cast %arg0 : i32 to index
    %80 = arith.index_cast %78 : i32 to index
    %81 = memref.load %arg3[%79, %80] : memref<2x8xi32, #tpu.memory_space<smem>>
    %82 = arith.sitofp %81 : i32 to f32
    %c0_32 = arith.constant 0 : index
    %c6 = arith.constant 6 : index
    %c0_33 = arith.constant 0 : index
    %c0_34 = arith.constant 0 : index
    %83 = vector.load %arg5[%c0_32, %c6, %c0_33, %c0_34] : memref<1x8x4x256xf32, #tpu.memory_space<vmem>>, vector<1x1x4x256xf32>
    %84 = vector.shape_cast %83 : vector<1x1x4x256xf32> to vector<4x256xf32>
    %85 = vector.broadcast %82 : f32 to vector<4x256xf32>
    %86 = arith.mulf %84, %85 : vector<4x256xf32>
    %87 = arith.addf %75, %86 : vector<4x256xf32>
    %c8_i32_35 = arith.constant 8 : i32
    %88 = arith.muli %arg2, %c8_i32_35 : i32
    %c7_i32_36 = arith.constant 7 : i32
    %89 = arith.addi %88, %c7_i32_36 : i32
    %c7_i32_37 = arith.constant 7 : i32
    %90 = arith.minsi %89, %c7_i32_37 : i32
    %91 = arith.index_cast %arg0 : i32 to index
    %92 = arith.index_cast %90 : i32 to index
    %93 = memref.load %arg3[%91, %92] : memref<2x8xi32, #tpu.memory_space<smem>>
    %94 = arith.sitofp %93 : i32 to f32
    %c0_38 = arith.constant 0 : index
    %c7 = arith.constant 7 : index
    %c0_39 = arith.constant 0 : index
    %c0_40 = arith.constant 0 : index
    %95 = vector.load %arg5[%c0_38, %c7, %c0_39, %c0_40] : memref<1x8x4x256xf32, #tpu.memory_space<vmem>>, vector<1x1x4x256xf32>
    %96 = vector.shape_cast %95 : vector<1x1x4x256xf32> to vector<4x256xf32>
    %97 = vector.broadcast %94 : f32 to vector<4x256xf32>
    %98 = arith.mulf %96, %97 : vector<4x256xf32>
    %99 = arith.addf %87, %98 : vector<4x256xf32>
    %c0_41 = arith.constant 0 : index
    %c0_42 = arith.constant 0 : index
    %100 = vector.load %arg7[%c0_41, %c0_42] : memref<4x256xf32, #tpu.memory_space<vmem>>, vector<4x256xf32>
    %101 = arith.addf %100, %99 : vector<4x256xf32>
    %c0_43 = arith.constant 0 : index
    %c0_44 = arith.constant 0 : index
    %102 = vector.load %arg7[%c0_43, %c0_44] : memref<4x256xf32, #tpu.memory_space<vmem>>, vector<4x256xf32>
    tpu.vector_store %arg7[%c0_43, %c0_44], %101 {strides = array<i32>} : memref<4x256xf32, #tpu.memory_space<vmem>>, vector<4x256xf32>,
    %c0_i32_45 = arith.constant 0 : i32
    %103 = arith.cmpi eq, %arg2, %c0_i32_45 : i32
    %104 = arith.extui %103 : i1 to i32
    %c0_i32_46 = arith.constant 0 : i32
    %105 = arith.cmpi ne, %104, %c0_i32_46 : i32
    scf.if %105 {
      %106 = arith.index_cast %arg0 : i32 to index
      %107 = memref.load %arg4[%106] : memref<2xi32, #tpu.memory_space<smem>>
      %108 = arith.sitofp %107 : i32 to f32
      %cst_47 = arith.constant 1.000000e+00 : f32
      %109 = arith.divf %cst_47, %108 : f32
      %c0_48 = arith.constant 0 : index
      %c0_49 = arith.constant 0 : index
      %110 = vector.load %arg7[%c0_48, %c0_49] : memref<4x256xf32, #tpu.memory_space<vmem>>, vector<4x256xf32>
      %111 = vector.broadcast %109 : f32 to vector<4x256xf32>
      %112 = arith.mulf %110, %111 : vector<4x256xf32>
      %c0_50 = arith.constant 0 : index
      %c0_51 = arith.constant 0 : index
      %c0_52 = arith.constant 0 : index
      %113 = vector.load %arg6[%c0_50, %c0_51, %c0_52] : memref<1x4x256xf32, #tpu.memory_space<vmem>>, vector<1x4x256xf32>
      %114 = vector.shape_cast %113 : vector<1x4x256xf32> to vector<4x256xf32>
      %115 = vector.shape_cast %112 : vector<4x256xf32> to vector<1x4x256xf32>
      tpu.vector_store %arg6[%c0_50, %c0_51, %c0_52], %115 {strides = array<i32>} : memref<1x4x256xf32, #tpu.memory_space<vmem>>, vector<1x4x256xf32>,
    } else {
    }
    return
  }
  func.func @transform_0(%arg0: i32, %arg1: i32, %arg2: i32, %arg3: memref<2x8xi32, #tpu.memory_space<smem>>, %arg4: memref<2xi32, #tpu.memory_space<smem>>) -> (i32, i32, i32, i32) {
    %c0_i32 = arith.constant 0 : i32
    %c0_i32_0 = arith.constant 0 : i32
    return %arg0, %arg2, %c0_i32, %arg1 : i32, i32, i32, i32
  }
  func.func @transform_1(%arg0: i32, %arg1: i32, %arg2: i32, %arg3: memref<2x8xi32, #tpu.memory_space<smem>>, %arg4: memref<2xi32, #tpu.memory_space<smem>>) -> (i32, i32, i32) {
    %c0_i32 = arith.constant 0 : i32
    %c0_i32_0 = arith.constant 0 : i32
    return %arg0, %c0_i32, %arg1 : i32, i32, i32
  }
}

</mosaic_0001>

<bundles_post_ra>
// kernel: tpu_custom_call.1
= control target key start
LH: loop header
LB: loop body
LE: loop exit
PB: predicated region body
PF: predicated region fallthrough
CT: control target
= control target key end

     0   :  { %s916_s0 = inlined_call_operand.hbm [shape: s32[2,8], index: 0, kind: input, shape index: {}]   ;;  %s917_s2 = inlined_call_operand.hbm [shape: f32[2,8,4,256], index: 2, kind: input, shape index: {}]   ;;  %s918_s3 = inlined_call_operand.hbm [shape: f32[2,4,256], index: 3, kind: output, shape index: {}]   ;;  %s919_s1 = inlined_call_operand.vmem [shape: s32[2], index: 1, kind: input, shape index: {}]  }
   0x1   :  { %s541_s14 = scalar_lea.hbm %s916_s0, 32 }
   0x2   :  { %p542_p0 = scmp.ne.s32.totalorder %s916_s0, %s541_s14  ;;  %p545_p1 = scmp.lt.u32.totalorder %s541_s14, %s916_s0 }
   0x4   :  { %p547_p2 = pnand %p545_p1, %p542_p0 }
   0x6   :  { %550 = shalt.err (!%p547_p2)  }
   0x7   :  { %s679_s19 = smov [#allocation4]   ;;  %s10_s24 = sshll.u32 %s919_s1, 4  ;;  %s11_s24 = int_to_ptr.vmem [resolvable:$true] %s10_s24 }
   0x8   :  { %9 = dma.hbm_to_smem %s916_s0, 32, %s679_s19, [#allocation3] }
   0x9   :  { %s551_s25 = scalar_lea.vmem %s11_s24, 16  ;;  %p556_p4 = scmp.lt.s32.totalorder %s11_s24, %s11_s24 }
   0xa   :  { %p552_p3 = scmp.ne.s32.totalorder %s11_s24, %s551_s25  ;;  %p557_p5 = scmp.lt.s32.totalorder %s551_s25, %s551_s25 }
   0xc   :  { %p558_p6 = por %p557_p5, %p556_p4 }
   0xe   :  { %p559_p7 = pnand %p558_p6, %p552_p3 }
  0x10   :  { %562 = shalt.err (!%p559_p7)  }
  0x11   :  { %s680_s26 = smov [#allocation5]  }
  0x12   :  { %13 = dma.vmem_to_smem %s11_s24, 16, %s680_s26, [#allocation3] }
  0x13   :  { %645 = dma.done.wait [#allocation3], 48 }
  0x14   :  { %646 = vsyncadd [#allocation3], 4294967248 }
  0x15   :  { %15 = sfence }
  0x16   :  { %16 = vsyncpa [#allocation7], 0 }
  0x17   :  { %18 = vsyncpa [#allocation7 + $0x1], 0 }
  0x18   :  { %19 = vsyncpa [#allocation8], 0 }
  0x19   :  { %21 = vsyncpa [#allocation8 + $0x1], 0  ;;  %s720_s0 = smov 0   ;;  %s722_s1 = smov 0  }
  0x1a   :  { %s724_s27 = smov 0   ;;  %s726_s28 = smov 0  }
  0x1b   :  { %s728_s29 = smov 0   ;;  %s730_s30 = smov 0  }
  0x1c LB: > { %s439_s4 = sadd.s32 4294967295, %s677_s30   ;;  %s440_s5 = sadd.s32 4294967294, %s677_s30   ;;  %s677_s30 = sphi %s730_s30, %s27_s30   ;;  %s673_s29 = sphi %s728_s29, %s934_s29   ;;  %s669_s28 = sphi %s726_s28, %s933_s28   ;;  %s665_s27 = sphi %s724_s27, %s932_s27   ;;  %s661_s1 = sphi %s722_s1, %s931_s1   ;;  %s657_s0 = sphi %s720_s0, %s930_s0  }
  0x1d   : > { %s46_s6 = sadd.s32 1, %s673_s29  ;;  %s57_s7 = sadd.s32 1, %s665_s27 }
  0x1e   : > { %p48_p8 = scmp.ge.s32.totalorder %s46_s6, 2  ;;  %p64_p9 = scmp.ne.s32.totalorder %s665_s27, %s661_s1 }
  0x1f   : > { %p65_p10 = scmp.eq.s32.totalorder %s677_s30, 0  ;;  %p70_p11 = scmp.ne.s32.totalorder %s661_s1, %s657_s0 }
  0x20   : > { %s936_s6 = smov (%p48_p8, %s46_s6), 0  ;;  %p71_p13 = scmp.eq.s32.totalorder %s439_s4, 0 }
  0x21   : > { %p761_p12 = por %p65_p10, %p64_p9  ;;  %s50_s9 = ssub.s32 %s673_s29, %s936_s6 }
  0x22   : > { %p96_p0 = scmp.eq.s32.totalorder %s439_s4, 1  ;;  %p55_p1 = scmp.eq.s32.totalorder %s50_s9, 0 }
  0x23   : > { %p767_p2 = por %p71_p13, %p70_p11  ;;  %p102_p4 = scmp.eq.s32.totalorder %s440_s5, 1 }
  0x24   : > { %p771_p3 = por %p96_p0, %p64_p9  ;;  %p485_p7 = scmp.lt.s32.totalorder %s677_s30, 2 }
  0x25   : > { %s776_s12 = scalar_select %p55_p1, %s665_s27, %s57_s7  }
  0x26   : > { %s923_s11 = scalar_select %p771_p3, 1, 0 }
  0x27   : > { %p778_p5 = por %p102_p4, %p70_p11  ;;  %s122_s14 = sand.u32 1, %s665_s27  }
  0x28   : > { %s443_s15 = sshll.u32 %s122_s14, 6  ;;  %s469_s16 = sshll.u32 %s673_s29, 10 }
  0x29   : > { %s924_s13 = scalar_select %p778_p5, 1, 0 }
  0x2a   : > { %s789_s19 = scalar_lea.hbm %s917_s2, %s469_s16  ;;  %s126_s20 = scalar_lea.vmem [#allocation6], %s443_s15 }
  0x2b   : > { %s138_s21 = sshll.u32 %s126_s20, 4  ;;  %p795_p8 = pnand %p485_p7, %p761_p12  ;;  %s791_s21 = int_to_ptr.vmem [resolvable:$true] %s138_s21 }
  0x2c   : > { %s800_s23 = scalar_lea.sflag [#allocation7], %s122_s14  ;;  %s563_s24 = scalar_lea.hbm %s789_s19, 1024 }
  0x2d   : > { %p564_p10 = scmp.ne.s32.totalorder %s789_s19, %s563_s24  ;;  %p565_p11 = pneg %p795_p8 }
  0x2e   : > { %s568_s4 = scalar_lea.hbm %s917_s2, 2048  ;;  %p569_p12 = scmp.lt.u32.totalorder %s789_s19, %s917_s2 }
  0x2f   : > { %p566_p13 = pnand %p565_p11, %p564_p10  ;;  %p570_p1 = scmp.lt.u32.totalorder %s568_s4, %s563_s24 }
  0x30   : > { %p572_p7 = scmp.lt.u32.totalorder %s563_s24, %s789_s19 }
  0x31   : > { %p567_p0 = pneg %p566_p13  ;;  %p571_p4 = por %p570_p1, %p569_p12 }
  0x33   : > { %p573_p6 = por %p572_p7, %p571_p4 }
  0x35   : > { %p574_p9 = pnand %p573_p6, %p567_p0 }
  0x37   : > { %577 = shalt.err (!%p574_p9)
}
  0x38   : > { %s578_s8 = scalar_lea.vmem %s791_s21, 1024  ;;  %s681_s9 = smov [#allocation6]  }
  0x39   : > { %p579_p10 = scmp.ne.s32.totalorder %s791_s21, %s578_s8  ;;  %s583_s14 = sshll.u32 %s681_s9, 4  ;;  %s584_s14 = int_to_ptr.vmem [resolvable:$false] %s583_s14 }
  0x3a   : > { %s585_s15 = scalar_lea.vmem %s584_s14, 2048  ;;  %p586_p3 = scmp.lt.s32.totalorder %s791_s21, %s584_s14 }
  0x3b   : > { %p581_p13 = pnand %p579_p10, %p565_p11  ;;  %p587_p12 = scmp.lt.s32.totalorder %s585_s15, %s578_s8 }
  0x3d   : > { %p582_p5 = pneg %p581_p13  ;;  %p588_p1 = por %p587_p12, %p586_p3 }
  0x3f   : > { %p589_p4 = pnand %p588_p1, %p582_p5 }
  0x41   : > { %592 = shalt.err (!%p589_p4)
}
  0x42   : > { %s682_s16 = smov 128   ;;  %s683_s17 = smov 8  }
  0x43   : > { %480 = dma.hbm_to_vmem [thread:$0]  (!%p795_p8), %s789_s19, 1024, %s791_s21, %s800_s23, %s682_s16, %s682_s16, %s683_s17  }
  0x44   : > { %p146_p6 = scmp.lt.s32.totalorder %s677_s30, 3  ;;  %p926_p9 = scmp.ge.s32.totalorder %s677_s30, 1 }
  0x46   : > { %p147_p11 = pnand %p926_p9, %p146_p6 }
  0x47   : > { %s832_s18 = sand.u32 (!%p147_p11), 1, %s661_s1  }
  0x48   : > { %150 = sbr.rel (%p147_p11) target bundleno = 167 (0xa7), region = 24  ;;  %s447_s20 = sshll.u32 (!%p147_p11), %s832_s18, 6 }
  0x49   : > { %s153_s24 = scalar_lea.sflag (!%p147_p11), [#allocation7], %s832_s18  ;;  %s836_s25 = scalar_lea.vmem (!%p147_p11), [#allocation6], %s447_s20 }
  0x4f   : > { %648 = dma.done.wait (%p767_p2), %s153_s24, 1024  }
  0x50   : > { %650 = vsyncadd (%p767_p2), %s153_s24, 4294966272  ;;  %s324_s19 = sld [smem:[#allocation5 + %s669_s28]]  ;;  %s844_s22 = sshll.u32 %s669_s28, 7  ;;  %v195_v2 = vld [vmem:[%s836_s25] sm:$0xff]  ;;  %v451_v4 = vld [vmem:[%s836_s25 + $0x8] sm:$0xff] }
  0x51   : > { %s208_s23 = sadd.s32 1, %s844_s22  ;;  %s193_s10 = sld [smem:[#allocation4 + %s844_s22]]  ;;  %v453_v8 = vld [vmem:[%s836_s25 + $0x10] sm:$0xff]  ;;  %v455_v12 = vld [vmem:[%s836_s25 + $0x18] sm:$0xff]  ;;  %v457_v16 = vld [vmem:[%s836_s25 + $0x20] sm:$0xff] }
  0x52   : > { %s209_s26 = sld [smem:[#allocation4 + %s208_s23]]  ;;  %s225_s4 = sadd.s32 2, %s844_s22  ;;  %v459_v20 = vld [vmem:[%s836_s25 + $0x28] sm:$0xff]  ;;  %v461_v24 = vld [vmem:[%s836_s25 + $0x30] sm:$0xff]  ;;  %v463_v28 = vld [vmem:[%s836_s25 + $0x38] sm:$0xff] }
  0x53   : > { %s226_s5 = sld [smem:[#allocation4 + %s225_s4]]  ;;  %s242_s7 = sadd.s32 3, %s844_s22 }
  0x54   : > { %s243_s8 = sld [smem:[#allocation4 + %s242_s7]]  ;;  %s259_s14 = sadd.s32 4, %s844_s22 }
  0x55   : > { %s260_s16 = sld [smem:[#allocation4 + %s259_s14]]  ;;  %s276_s17 = sadd.s32 5, %s844_s22 }
  0x56   : > { %s325_s21 = scvt.s32.f32 %s324_s19  ;;  %s277_s24 = sld [smem:[#allocation4 + %s276_s17]] }
  0x57   : > { %s194_s9 = scvt.s32.f32 %s193_s10  ;;  %s293_s19 = sadd.s32 6, %s844_s22 }
  0x58   : > { %v326_v0 = vstv %s325_s21  ;;  %s210_s28 = scvt.s32.f32 %s209_s26  ;;  %s294_s23 = sld [smem:[#allocation4 + %s293_s19]] }
  0x59   : > { %539 = vrcp.f32 %v326_v0  ;;  %v196_v3 = vstv %s194_s9  ;;  %s227_s15 = scvt.s32.f32 %s226_s5  ;;  %s310_s10 = sadd.s32 7, %s844_s22 }
  0x5a   : > { %v213_v5 = vstv %s210_s28  ;;  %v197_v6 = vmul.f32 %v196_v3, %v195_v2  ;;  %s244_s20 = scvt.s32.f32 %s243_s8  ;;  %s311_s4 = sld [smem:[#allocation4 + %s310_s10]] }
  0x5b   : > { %v214_v7 = vmul.f32 %v451_v4, %v213_v5  ;;  %v230_v9 = vstv %s227_s15  ;;  %s261_s21 = scvt.s32.f32 %s260_s16  ;;  %s448_s8 = sshll.u32 %s832_s18, 3 }
  0x5c   : > { %v231_v11 = vmul.f32 %v453_v8, %v230_v9  ;;  %v247_v13 = vstv %s244_s20  ;;  %s278_s26 = scvt.s32.f32 %s277_s24  ;;  %s174_s9 = scalar_lea.vmem [#allocation9], %s448_s8 }
  0x5d   : > { %v215_v10 = vadd.f32 %v214_v7, %v197_v6  ;;  %v248_v15 = vmul.f32 %v455_v12, %v247_v13  ;;  %v264_v17 = vstv %s261_s21  ;;  %s350_s28 = sshll.u32 %s174_s9, 4  ;;  %s867_s17 = scalar_lea.hbm %s918_s3, %s844_s22  ;;  %s869_s28 = int_to_ptr.vmem [resolvable:$true] %s350_s28 }
  0x5e   : > { %v265_v19 = vmul.f32 %v457_v16, %v264_v17  ;;  %v281_v21 = vstv %s278_s26  ;;  %s295_s5 = scvt.s32.f32 %s294_s23  ;;  %s334_s25 = scalar_lea.sflag [#allocation8], %s832_s18 }
  0x5f   : > { %v232_v14 = vadd.f32 %v231_v11, %v215_v10  ;;  %v282_v23 = vmul.f32 %v459_v20, %v281_v21  ;;  %s593_s20 = scalar_lea.vmem %s869_s28, 128  ;;  %p927_p3 = scmp.ne.s32.totalorder %s923_s11, 0 }
  0x60   : > { %v298_v25 = vstv %s295_s5  ;;  %s312_s7 = scvt.s32.f32 %s311_s4  ;;  %p594_p2 = scmp.ne.s32.totalorder %s869_s28, %s593_s20 }
  0x61   : > { %v249_v18 = vadd.f32 %v248_v15, %v232_v14  ;;  %v299_v27 = vmul.f32 %v461_v24, %v298_v25  ;;  %s684_s24 = smov [#allocation9]  }
  0x62   : > { %v315_v29 = vstv %s312_s7  ;;  %p595_p5 = pnand %p594_p2, %p927_p3  ;;  %s597_s19 = sshll.u32 %s684_s24, 4  ;;  %s598_s19 = int_to_ptr.vmem [resolvable:$false] %s597_s19 }
  0x63   : > { %v540_v1 = vpop.eup %539  ;;  %v266_v22 = vadd.f32 %v265_v19, %v249_v18  ;;  %v316_v31 = vmul.f32 %v463_v28, %v315_v29  ;;  %s599_s21 = scalar_lea.vmem %s598_s19, 256  ;;  %p600_p0 = scmp.lt.s32.totalorder %s869_s28, %s598_s19 }
  0x64   : > { %471 = vpush %v540_v1  ;;  %p596_p8 = pneg %p595_p5  ;;  %p601_p7 = scmp.lt.s32.totalorder %s599_s21, %s593_s20 }
  0x65   : > { %v283_v26 = vadd.f32 %v282_v23, %v266_v22 }
  0x66   : > { %p602_p10 = por %p601_p7, %p600_p0 }
  0x67   : > { %v300_v30 = vadd.f32 %v299_v27, %v283_v26 }
  0x68   : > { %p603_p13 = pnand %p602_p10, %p596_p8 }
  0x69   : > { %v317_v32 = vadd.f32 %v316_v31, %v300_v30 }
  0x95   : > { %s472_s14 = spop %471 }
  0x96   : > { %v330_v33 = vstv %s472_s14 }
  0x97   : > { %v331_v34 = vmul.f32 %v330_v33, %v317_v32 }
  0x99   : > { %332 = vst [vmem:[%s174_s9] sm:$0xff] %v331_v34 }
  0x9a   : > { %606 = shalt.err (!%p603_p13)
}
  0x9b   : > { %s607_s18 = scalar_lea.hbm %s867_s17, 128  ;;  %s611_s10 = scalar_lea.hbm %s918_s3, 256 }
  0x9c   : > { %p608_p12 = scmp.ne.s32.totalorder %s867_s17, %s607_s18  ;;  %p612_p6 = scmp.lt.u32.totalorder %s867_s17, %s918_s3 }
  0x9d   : > { %p613_p9 = scmp.lt.u32.totalorder %s611_s10, %s607_s18  ;;  %p615_p2 = scmp.lt.u32.totalorder %s607_s18, %s867_s17 }
  0x9e   : > { %p609_p1 = pnand %p608_p12, %p927_p3 }
  0x9f   : > { %p614_p11 = por %p613_p9, %p612_p6 }
  0xa0   : > { %p610_p4 = pneg %p609_p1 }
  0xa1   : > { %p616_p5 = por %p615_p2, %p614_p11 }
  0xa3   : > { %p617_p8 = pnand %p616_p5, %p610_p4 }
  0xa5   : > { %620 = shalt.err (!%p617_p8)
}
  0xa6   : > { %475 = dma.vmem_to_hbm [thread:$0]  (%p927_p3), %s869_s28, 128, %s867_s17, %s334_s25  }
  0xa7 PF: > { %s362_s5 = sand.u32 1, %s657_s0   ;;  %p928_p0 = scmp.ne.s32.totalorder %s924_s13, 0 }
  0xa8   : > { %p929_p7 = scmp.ge.s32.totalorder %s677_s30, 2  ;;  %s363_s7 = scalar_lea.sflag [#allocation8], %s362_s5 }
  0xaa   : > { %p482_p10 = pnand %p929_p7, %p928_p0 }
  0xac   : > { %652 = dma.done.wait (!%p482_p10), %s363_s7, 128  }
  0xad   : > { %654 = vsyncadd (!%p482_p10), %s363_s7, 4294967168  ;;  %s27_s30 = sadd.s32 1, %s677_s30   ;;  %s930_s0 = smov %s661_s1 }
  0xae   : > { %p24_p13 = scmp.ge.s32.totalorder %s27_s30, 4   ;;  %s931_s1 = smov %s665_s27 }
  0xaf   : > { %s932_s27 = smov %s776_s12  ;;  %s933_s28 = smov %s673_s29 }
  0xb0   : > { %s934_s29 = smov %s936_s6  ;;  %26 = sbr.rel (!%p24_p13) target bundleno = 28 (0x1c), region = 84 }
  0xb7   :  { %368 = vsyncpa [#allocation7], 1 }
  0xb8   :  { %370 = vsyncpa [#allocation7 + $0x1], 1 }
  0xb9   :  { %371 = vsyncpa [#allocation8], 1 }
  0xba   :  { %373 = vsyncpa [#allocation8 + $0x1], 1 }

</bundles_post_ra>
